<compile_context>
chip_gen: v7x
topology: tpu7x:2x2x1
jax: 0.10.0
libtpu: 0.0.40
codegen_flags: <defaults>
</compile_context>

<pallas_src>
import functools
import math
import numpy as np
import jax
import jax.numpy as jnp
from jax.experimental import pallas as pl
from jax.experimental.pallas import tpu as pltpu


def _round_up(x, m):
    return (x + m - 1) // m * m


# ---------------------------------------------------------------------------
# Host-side setup (batch independent): irreps bookkeeping, Wigner-3j table,
# dense coefficient tables in kernel-friendly (all-matmul) form.
# ---------------------------------------------------------------------------

def _w3j(l1, l2, l3):
    """Real-basis Wigner-3j symbols for l <= 1 (e3nn normalization: sum of squares = 1)."""
    key = (l1, l2, l3)
    if key == (0, 0, 0):
        return np.ones((1, 1, 1), np.float64)
    if key == (1, 1, 0):
        return np.eye(3)[:, :, None] / math.sqrt(3.0)
    if key == (0, 1, 1):
        return np.eye(3)[None, :, :] / math.sqrt(3.0)
    if key == (1, 0, 1):
        return np.eye(3)[:, None, :] / math.sqrt(3.0)
    if key == (1, 1, 1):
        eps = np.zeros((3, 3, 3), np.float64)
        for (i, j, k) in [(0, 1, 2), (1, 2, 0), (2, 0, 1)]:
            eps[i, j, k] = 1.0
            eps[i, k, j] = -1.0
        return eps / math.sqrt(6.0)
    # TODO(synk): general Wigner-3j for l > 1 not implemented; this module uses l_max = 1.
    raise NotImplementedError(f"w3j{key}")


def _irrep_sort_key(ir):
    l, p = ir
    # e3nn irrep ordering: 0e, 0o, 1o, 1e, 2e, 2o, ...
    return (l, p * (-1) ** (l + 1))


def build_depthwise_tp(irreps_in1, irreps_in2, l_max, mode="uvuv", trainable=True):
    """Mirror of DepthwiseTensorProduct._get_irreps_out_and_instructions plus dense
    coefficient tables arranged so the kernel only needs plain (M,K)@(K,N) matmuls."""
    assert mode == "uvuv"  # the weight factorization below is specific to 'uvuv'

    irreps_out = []
    instructions = []
    for i, (mul1, (l1, p1)) in enumerate(irreps_in1):
        for j, (mul2, (l2, p2)) in enumerate(irreps_in2):
            for l_out in range(abs(l1 - l2), l1 + l2 + 1):
                if l_out <= l_max:
                    k = len(irreps_out)
                    irreps_out.append((mul1 * mul2, (l_out, p1 * p2)))
                    instructions.append((i, j, k, mode, trainable))

    order = sorted(range(len(irreps_out)), key=lambda t: _irrep_sort_key(irreps_out[t][1]))
    perm = [0] * len(order)
    for new, old in enumerate(order):
        perm[old] = new
    irreps_out = [irreps_out[old] for old in order]
    instructions = [(i1, i2, perm[k], m, tr) for (i1, i2, k, m, tr) in instructions]
    instructions = sorted(instructions, key=lambda x: x[2])

    def dims_offsets(irreps):
        offs, off = [], 0
        for mul, (l, _p) in irreps:
            offs.append(off)
            off += mul * (2 * l + 1)
        return offs, off

    off1, D1 = dims_offsets(irreps_in1)
    off2, D2 = dims_offsets(irreps_in2)
    offo, Do = dims_offsets(irreps_out)
    weight_numel = sum(irreps_in1[i1][0] * irreps_in2[i2][0] for (i1, i2, *_r) in instructions)

    # Factorized form (exact for 'uvuv': every output element belongs to exactly one path
    # and one (u, v) pair):
    #   out[z, o] = (weights[z] @ S)[o] * sum_{a,b} x1[z, a] * x2[z, b] * C[b, a, o]
    C = np.zeros((D2, D1, Do), np.float32)
    S = np.zeros((weight_numel, Do), np.float32)
    woff = 0
    for (i1, i2, io, _m, _tr) in instructions:
        mul1, (l1, _) = irreps_in1[i1]
        mul2, (l2, _) = irreps_in2[i2]
        _mulo, (lo, _) = irreps_out[io]
        d1, d2, do = 2 * l1 + 1, 2 * l2 + 1, 2 * lo + 1
        # e3nn normalization: irrep_normalization='component', path_normalization='element',
        # num_elements('uvuv') == 1 and unique i_out per instruction -> sqrt(dim(ir_out)).
        cg = _w3j(l1, l2, lo) * math.sqrt(do)
        for u in range(mul1):
            for v in range(mul2):
                oo = offo[io] + (u * mul2 + v) * do
                S[woff + u * mul2 + v, oo:oo + do] = 1.0
                for ii in range(d1):
                    a = off1[i1] + u * d1 + ii
                    for jj in range(d2):
                        b = off2[i2] + v * d2 + jj
                        C[b, a, oo:oo + do] += cg[ii, jj, :]
        woff += mul1 * mul2

    # Kernel constants. The (b, o) group structure lives entirely inside these host-built
    # matrices so the kernel needs no reshapes/transposes at all:
    #   CB[a, b*Do + o] = C[b, a, o]        (D1, D2*Do)   x1-side expansion
    #   E [b, b*Do + o] = 1                 (D2, D2*Do)   x2 lane replication
    #   R [b*Do + o, o] = 1                 (D2*Do, Do)   contraction over b
    #   S [w, o]                            (WN, Do)      per-path weight scatter
    # TODO(synk): for production multiplicities exploit the block-diagonal per-path
    # structure of C instead of dense (D1, D2*Do)/(D2*Do, Do) tables (K = D2*Do grows and
    # is mostly zeros), tiling K per instruction and aligning K tiles to the MXU.
    CB = np.ascontiguousarray(np.transpose(C, (1, 0, 2)).reshape(D1, D2 * Do))
    E = np.zeros((D2, D2 * Do), np.float32)
    R = np.zeros((D2 * Do, Do), np.float32)
    for b in range(D2):
        E[b, b * Do:(b + 1) * Do] = 1.0
        R[b * Do:(b + 1) * Do, :] = np.eye(Do, dtype=np.float32)

    meta = dict(D1=D1, D2=D2, Do=Do, weight_numel=weight_numel,
                irreps_in1=irreps_in1, irreps_in2=irreps_in2, irreps_out=irreps_out,
                instructions=instructions, off1=off1, off2=off2, offo=offo)
    return jnp.asarray(CB), jnp.asarray(E), jnp.asarray(R), jnp.asarray(S), meta


# ---------------------------------------------------------------------------
# Pallas kernel: everything batch-major (batch in sublanes, features in lanes),
# all contractions are ordinary MXU matmuls, all accumulation/elementwise math f32.
# ---------------------------------------------------------------------------

def _dtp_kernel(x1_ref, x2_ref, w_ref, cb_ref, e_ref, r_ref, s_ref, o_ref, *, mxu_dtype):
    x1 = x1_ref[...]                               # (TB, D1)
    x2 = x2_ref[...]                               # (TB, D2)
    w = w_ref[...]                                 # (TB, WN)
    if mxu_dtype != jnp.float32:                   # constants are pre-cast on the host
        x1 = x1.astype(mxu_dtype)
        x2 = x2.astype(mxu_dtype)
        w = w.astype(mxu_dtype)

    # g[z, b*Do + o]   = sum_a x1[z, a] * C[b, a, o]
    g = jnp.dot(x1, cb_ref[...], preferred_element_type=jnp.float32)     # (TB, D2*Do)
    # x2e[z, b*Do + o] = x2[z, b]   (0/1 replication matrix; MXU has plenty of slack)
    x2e = jnp.dot(x2, e_ref[...], preferred_element_type=jnp.float32)    # (TB, D2*Do)

    h = g * x2e                                                          # f32 VPU
    if mxu_dtype != jnp.float32:
        h = h.astype(mxu_dtype)

    # raw[z, o] = sum_b h[z, b*Do + o]
    raw = jnp.dot(h, r_ref[...], preferred_element_type=jnp.float32)     # (TB, Do)
    # wg[z, o]  = sum_w weights[z, w] * S[w, o]
    wg = jnp.dot(w, s_ref[...], preferred_element_type=jnp.float32)      # (TB, Do)

    # NOTE: the four dots could be fused into fewer block-diagonal matmuls (old v5e MRF
    # micro-opt), but the MXU is far from the binding slot here so it is not worth it.
    o_ref[...] = (raw * wg).astype(o_ref.dtype)


def depthwise_tensor_product(x1, x2, weights, CB, E, R, S, *, block_b=4096,
                             use_bf16_mxu=False, vmem_limit_bytes=48 * 1024 * 1024):
    """x1:(B,D1), x2:(B,D2), weights:(B,WN) -> (B,Do), all batch-major (no wrapper
    transposes / full-array pads).  block_b (multiple of 128) is the row tile for large
    batches; sweep 2048-8192.  Medium batches run exactly 2 parallel grid steps so both
    v7x TensorCores are used.  use_bf16_mxu is OFF by default (MXU is not the bottleneck
    at these shapes; re-validate tolerances per config before enabling)."""
    B, D1 = x1.shape
    B2, D2 = x2.shape
    K = CB.shape[1]
    Do = R.shape[1]
    WN = S.shape[0]
    assert B2 == B and weights.shape == (B, WN)
    assert CB.shape == (D1, K) and E.shape == (D2, K) and R.shape == (K, Do)
    assert block_b % 128 == 0, "block_b must be a multiple of 128"

    # --- batch tile selection -------------------------------------------------------
    # Per-row VMEM: the narrow (tb, D) blocks are lane-padded to 128 in VMEM, so the
    # double-buffered blocks cost ~4 KB/row plus ~1.5 KB/row of (tb, *) temporaries;
    # 2048-8192-row tiles stay well inside the 48 MiB scoped limit set below (v7x has
    # 64 MiB physical VMEM per TensorCore, v5e/v6e have 128 MiB).
    if B >= 2 * block_b:
        tb = block_b                                   # many well-amortized steps
    elif B > 256:
        tb = _round_up(pl.cdiv(B, 2), 128)             # exactly 2 parallel steps (v7x: 2 TCs)
    else:
        tb = _round_up(max(B, 8), 8)                   # tiny batch: a single step

    pad = tb - B if tb > B else 0                      # only the tiny-batch branch (< 8 rows)
    if pad:
        x1 = jnp.pad(x1, ((0, pad), (0, 0)))
        x2 = jnp.pad(x2, ((0, pad), (0, 0)))
        weights = jnp.pad(weights, ((0, pad), (0, 0)))
    Bp = B + pad
    # Ragged last tiles (B not a multiple of tb) are masked by the Pallas pipeline
    # (partial boundary DMA); no full-array padding pass is needed.
    grid = (pl.cdiv(Bp, tb),)

    consts = (CB, E, R, S)
    if use_bf16_mxu:
        consts = tuple(c.astype(jnp.bfloat16) for c in consts)   # pre-cast once on host
    kernel = functools.partial(
        _dtp_kernel, mxu_dtype=jnp.bfloat16 if use_bf16_mxu else jnp.float32)

    out = pl.pallas_call(
        kernel,
        out_shape=jax.ShapeDtypeStruct((Bp, Do), x1.dtype),
        grid_spec=pltpu.PrefetchScalarGridSpec(
            num_scalar_prefetch=0,
            grid=grid,
            in_specs=[
                pl.BlockSpec((tb, D1), lambda i: (i, 0)),
                pl.BlockSpec((tb, D2), lambda i: (i, 0)),
                pl.BlockSpec((tb, WN), lambda i: (i, 0)),
                # Grid-invariant tables: constant block index -> the pipeline DMAs them
                # once and reuses the same VMEM buffer on every grid step.
                pl.BlockSpec((D1, K), lambda i: (0, 0)),
                pl.BlockSpec((D2, K), lambda i: (0, 0)),
                pl.BlockSpec((K, Do), lambda i: (0, 0)),
                pl.BlockSpec((WN, Do), lambda i: (0, 0)),
            ],
            out_specs=pl.BlockSpec((tb, Do), lambda i: (i, 0)),
        ),
        compiler_params=pltpu.CompilerParams(
            dimension_semantics=("parallel",),
            vmem_limit_bytes=vmem_limit_bytes,
        ),
    )(x1, x2, weights, *consts)
    return out if pad == 0 else out[:B]


# ---------------------------------------------------------------------------
# Pure NumPy reference (per-path einsum, mirrors e3nn's 'uvuv' contraction)
# ---------------------------------------------------------------------------

def reference_forward(x1, x2, weights, meta):
    x1 = np.asarray(x1, np.float64)
    x2 = np.asarray(x2, np.float64)
    w = np.asarray(weights, np.float64)
    B = x1.shape[0]
    out = np.zeros((B, meta["Do"]), np.float64)
    woff = 0
    for (i1, i2, io, _m, _tr) in meta["instructions"]:
        mul1, (l1, _) = meta["irreps_in1"][i1]
        mul2, (l2, _) = meta["irreps_in2"][i2]
        _mulo, (lo, _) = meta["irreps_out"][io]
        d1, d2, do = 2 * l1 + 1, 2 * l2 + 1, 2 * lo + 1
        cg = _w3j(l1, l2, lo) * math.sqrt(do)
        xb1 = x1[:, meta["off1"][i1]:meta["off1"][i1] + mul1 * d1].reshape(B, mul1, d1)
        xb2 = x2[:, meta["off2"][i2]:meta["off2"][i2] + mul2 * d2].reshape(B, mul2, d2)
        wb = w[:, woff:woff + mul1 * mul2].reshape(B, mul1, mul2)
        res = np.einsum("zuv,ijk,zui,zvj->zuvk", wb, cg, xb1, xb2)
        oo = meta["offo"][io]
        out[:, oo:oo + mul1 * mul2 * do] += res.reshape(B, -1)
        woff += mul1 * mul2
    return out


if __name__ == "__main__":
    # Config: max_rotation_order=1, irreps_input1 = "2x0e + 2x1o" (dim 8),
    #         irreps_input2 = "1x0e + 1x1o" (dim 4), mode='uvuv', trainable=True.
    irreps_in1 = [(2, (0, 1)), (2, (1, -1))]
    irreps_in2 = [(1, (0, 1)), (1, (1, -1))]
    CB, E, R, S, meta = build_depthwise_tp(irreps_in1, irreps_in2, l_max=1, mode="uvuv")

    # B=512 exercises the "exactly 2 parallel grid steps" path (tb=256) that keeps both
    # v7x TensorCores busy while staying small; feature dims are tiny (8/4/10/22).
    B = 512
    key = jax.random.PRNGKey(0)
    k1, k2, k3 = jax.random.split(key, 3)
    x1 = jax.random.normal(k1, (B, meta["D1"]), jnp.float32)                  # (512, 8)
    x2 = jax.random.normal(k2, (B, meta["D2"]), jnp.float32)                  # (512, 4)
    weights = jax.random.normal(k3, (B, meta["weight_numel"]), jnp.float32)   # (512, 10)

    out = depthwise_tensor_product(x1, x2, weights, CB, E, R, S)
    out = jax.block_until_ready(out)

    ref = reference_forward(x1, x2, weights, meta)
    assert out.shape == (B, meta["Do"])
    np.testing.assert_allclose(np.asarray(out, np.float64), ref, rtol=1e-4, atol=1e-5)
    print("KERNEL_OK")
</pallas_src>

<mosaic_0001>
module attributes {stable_mosaic.version = 11 : i64} {
  func.func @_dtp_kernel(%arg0: i32, %arg1: memref<256x8xf32, #tpu.memory_space<vmem>>, %arg2: memref<256x4xf32, #tpu.memory_space<vmem>>, %arg3: memref<256x10xf32, #tpu.memory_space<vmem>>, %arg4: memref<8x88xf32, #tpu.memory_space<vmem>>, %arg5: memref<4x88xf32, #tpu.memory_space<vmem>>, %arg6: memref<88x22xf32, #tpu.memory_space<vmem>>, %arg7: memref<10x22xf32, #tpu.memory_space<vmem>>, %arg8: memref<256x22xf32, #tpu.memory_space<vmem>>) attributes {dimension_semantics = [#tpu.dimension_semantics<parallel>], iteration_bounds = array<i64: 2>, scalar_prefetch = 0 : i64, scratch_operands = 0 : i64, tpu.core_type = #tpu.core_type<tc>, window_params = [{transform_indices = @transform_0, window_bounds = array<i64: 256, 8>}, {transform_indices = @transform_1, window_bounds = array<i64: 256, 4>}, {transform_indices = @transform_2, window_bounds = array<i64: 256, 10>}, {pipeline_mode = #tpu.pipeline_mode<synchronous>, transform_indices = @transform_3, window_bounds = array<i64: 8, 88>}, {pipeline_mode = #tpu.pipeline_mode<synchronous>, transform_indices = @transform_4, window_bounds = array<i64: 4, 88>}, {pipeline_mode = #tpu.pipeline_mode<synchronous>, transform_indices = @transform_5, window_bounds = array<i64: 88, 22>}, {pipeline_mode = #tpu.pipeline_mode<synchronous>, transform_indices = @transform_6, window_bounds = array<i64: 10, 22>}, {transform_indices = @transform_7, window_bounds = array<i64: 256, 22>}]} {
    %c0 = arith.constant 0 : index
    %c0_0 = arith.constant 0 : index
    %0 = vector.load %arg1[%c0, %c0_0] : memref<256x8xf32, #tpu.memory_space<vmem>>, vector<256x8xf32>
    %c0_1 = arith.constant 0 : index
    %c0_2 = arith.constant 0 : index
    %1 = vector.load %arg2[%c0_1, %c0_2] : memref<256x4xf32, #tpu.memory_space<vmem>>, vector<256x4xf32>
    %c0_3 = arith.constant 0 : index
    %c0_4 = arith.constant 0 : index
    %2 = vector.load %arg3[%c0_3, %c0_4] : memref<256x10xf32, #tpu.memory_space<vmem>>, vector<256x10xf32>
    %c0_5 = arith.constant 0 : index
    %c0_6 = arith.constant 0 : index
    %3 = vector.load %arg4[%c0_5, %c0_6] : memref<8x88xf32, #tpu.memory_space<vmem>>, vector<8x88xf32>
    %cst = arith.constant dense<0.000000e+00> : vector<256x88xf32>
    %4 = tpu.matmul %0, %3, %cst {dimension_numbers = #tpu.dot_dimension_numbers<[1], [0], [0], [1], [0, 0, 1, 1], [], []>} : vector<256x8xf32>, vector<8x88xf32>, vector<256x88xf32> -> vector<256x88xf32>
    %c0_7 = arith.constant 0 : index
    %c0_8 = arith.constant 0 : index
    %5 = vector.load %arg5[%c0_7, %c0_8] : memref<4x88xf32, #tpu.memory_space<vmem>>, vector<4x88xf32>
    %cst_9 = arith.constant dense<0.000000e+00> : vector<256x88xf32>
    %6 = tpu.matmul %1, %5, %cst_9 {dimension_numbers = #tpu.dot_dimension_numbers<[1], [0], [0], [1], [0, 0, 1, 1], [], []>} : vector<256x4xf32>, vector<4x88xf32>, vector<256x88xf32> -> vector<256x88xf32>
    %7 = arith.mulf %4, %6 : vector<256x88xf32>
    %c0_10 = arith.constant 0 : index
    %c0_11 = arith.constant 0 : index
    %8 = vector.load %arg6[%c0_10, %c0_11] : memref<88x22xf32, #tpu.memory_space<vmem>>, vector<88x22xf32>
    %cst_12 = arith.constant dense<0.000000e+00> : vector<256x22xf32>
    %9 = tpu.matmul %7, %8, %cst_12 {dimension_numbers = #tpu.dot_dimension_numbers<[1], [0], [0], [1], [0, 0, 1, 1], [], []>} : vector<256x88xf32>, vector<88x22xf32>, vector<256x22xf32> -> vector<256x22xf32>
    %c0_13 = arith.constant 0 : index
    %c0_14 = arith.constant 0 : index
    %10 = vector.load %arg7[%c0_13, %c0_14] : memref<10x22xf32, #tpu.memory_space<vmem>>, vector<10x22xf32>
    %cst_15 = arith.constant dense<0.000000e+00> : vector<256x22xf32>
    %11 = tpu.matmul %2, %10, %cst_15 {dimension_numbers = #tpu.dot_dimension_numbers<[1], [0], [0], [1], [0, 0, 1, 1], [], []>} : vector<256x10xf32>, vector<10x22xf32>, vector<256x22xf32> -> vector<256x22xf32>
    %12 = arith.mulf %9, %11 : vector<256x22xf32>
    %c0_16 = arith.constant 0 : index
    %c0_17 = arith.constant 0 : index
    %13 = vector.load %arg8[%c0_16, %c0_17] : memref<256x22xf32, #tpu.memory_space<vmem>>, vector<256x22xf32>
    tpu.vector_store %arg8[%c0_16, %c0_17], %12 {strides = array<i32>} : memref<256x22xf32, #tpu.memory_space<vmem>>, vector<256x22xf32>,
    return
  }
  func.func @transform_0(%arg0: i32) -> (i32, i32) {
    %c0_i32 = arith.constant 0 : i32
    %c0_i32_0 = arith.constant 0 : i32
    return %arg0, %c0_i32 : i32, i32
  }
  func.func @transform_1(%arg0: i32) -> (i32, i32) {
    %c0_i32 = arith.constant 0 : i32
    %c0_i32_0 = arith.constant 0 : i32
    return %arg0, %c0_i32 : i32, i32
  }
  func.func @transform_2(%arg0: i32) -> (i32, i32) {
    %c0_i32 = arith.constant 0 : i32
    %c0_i32_0 = arith.constant 0 : i32
    return %arg0, %c0_i32 : i32, i32
  }
  func.func @transform_3(%arg0: i32) -> (i32, i32) {
    %c0_i32 = arith.constant 0 : i32
    %c0_i32_0 = arith.constant 0 : i32
    %c0_i32_1 = arith.constant 0 : i32
    return %c0_i32, %c0_i32_0 : i32, i32
  }
  func.func @transform_4(%arg0: i32) -> (i32, i32) {
    %c0_i32 = arith.constant 0 : i32
    %c0_i32_0 = arith.constant 0 : i32
    %c0_i32_1 = arith.constant 0 : i32
    return %c0_i32, %c0_i32_0 : i32, i32
  }
  func.func @transform_5(%arg0: i32) -> (i32, i32) {
    %c0_i32 = arith.constant 0 : i32
    %c0_i32_0 = arith.constant 0 : i32
    %c0_i32_1 = arith.constant 0 : i32
    return %c0_i32, %c0_i32_0 : i32, i32
  }
  func.func @transform_6(%arg0: i32) -> (i32, i32) {
    %c0_i32 = arith.constant 0 : i32
    %c0_i32_0 = arith.constant 0 : i32
    %c0_i32_1 = arith.constant 0 : i32
    return %c0_i32, %c0_i32_0 : i32, i32
  }
  func.func @transform_7(%arg0: i32) -> (i32, i32) {
    %c0_i32 = arith.constant 0 : i32
    %c0_i32_0 = arith.constant 0 : i32
    return %arg0, %c0_i32 : i32, i32
  }
}

</mosaic_0001>

<bundles_post_ra>
// kernel: tpu_custom_call.1
= control target key start
LH: loop header
LB: loop body
LE: loop exit
PB: predicated region body
PF: predicated region fallthrough
CT: control target
= control target key end

     0   :  { %s2504_s24 = smov 0   ;;  %s2936_s0 = inlined_call_operand.vmem [shape: f32[512,8], index: 0, kind: input, shape index: {}]   ;;  %s2937_s1 = inlined_call_operand.vmem [shape: f32[512,4], index: 1, kind: input, shape index: {}]   ;;  %s2938_s2 = inlined_call_operand.vmem [shape: f32[512,10], index: 2, kind: input, shape index: {}]   ;;  %s2939_s3 = inlined_call_operand.vmem [shape: f32[8,88], index: 3, kind: input, shape index: {}]   ;;  %s2940_s4 = inlined_call_operand.vmem [shape: f32[4,88], index: 4, kind: input, shape index: {}]   ;;  %s2941_s5 = inlined_call_operand.vmem [shape: f32[88,22], index: 5, kind: input, shape index: {}]   ;;  %s2942_s6 = inlined_call_operand.vmem [shape: f32[10,22], index: 6, kind: input, shape index: {}]   ;;  %s2943_s7 = inlined_call_operand.vmem [shape: f32[512,22], index: 7, kind: output, shape index: {}]  }
   0x1 LB: > { %s1910_s25 = sadd.s32 4294967295, %s2461_s24   ;;  %p1914_p0 = scmp.ge.s32.totalorder %s2461_s24, 1  ;;  %s2461_s24 = sphi %s2504_s24, %s17_s24  }
   0x2   : > { %p260_p1 = scmp.lt.s32.totalorder %s2461_s24, 3 }
   0x4   : > { %p261_p2 = pnand %p1914_p0, %p260_p1 }
   0x5   : > { %v422_v0 = vld [vmem:[%s2939_s3] sm:$0xff] (!%p261_p2)  ;;  %vm843_vm0 = vcmask (!%p261_p2), 1043456   ;;  %s1915_s30 = sshll.u32 (!%p261_p2), %s1910_s25, 5  ;;  %v1105_v3 = vld [vmem:[%s2941_s5 + $0x8] sm:$0xff] (!%p261_p2)  ;;  %vm1536_vm1 = vcmask (!%p261_p2), 1041408   ;;  %vm2463_vm2 = vmmov (!%p261_p2), 1  }
   0x6   : > { %264 = sbr.rel (%p261_p2) target bundleno = 511 (0x1ff), region = 48  ;;  %v745_v1 = vld [vmem:[%s2940_s4] sm:$0xf] (!%p261_p2)  ;;  %2198 = vmatprep.subr.mxu0 (!%p261_p2), %v422_v0  ;;  %p303_p3 = scmp.lt.s32.totalorder (!%p261_p2), %s1915_s30, 63  ;;  %v1438_v6 = vld [vmem:[%s2942_s6 + $0x8] sm:$0x3] (!%p261_p2)  ;;  %vm2530_vm3 = vmpackc.low (!%p261_p2), %vm1536_vm1, %vm2463_vm2 }
   0x7   : > { %2248 = vmatprep.subr.msk.mxu1 (!%p261_p2), %vm843_vm0, %v745_v1  ;;  %v1104_v2 = vld [vmem:[%s2941_s5] sm:$0xff] (!%p261_p2)  ;;  %2199 = vmatpush3.msra.mxu0 (!%p261_p2), %v422_v0  ;;  %vm423_vm4 = vcmask (!%p261_p2), 64512   ;;  %vm746_vm5 = vcmask (!%p261_p2), 31744   ;;  %v1106_v9 = vld [vmem:[%s2941_s5 + $0x10] sm:$0xff] (!%p261_p2)  ;;  %v1107_v10 = vld [vmem:[%s2941_s5 + $0x18] sm:$0xff] (!%p261_p2)  ;;  %vm1439_vm6 = vcmask (!%p261_p2), 80896  }
   0x8   : > { %v1437_v4 = vld [vmem:[%s2942_s6] sm:$0xff] (!%p261_p2)  ;;  %2249 = vmatpush3.msk.msra.mxu1 (!%p261_p2), %vm843_vm0, %v745_v1  ;;  %v2420_v5 = vpack.c.bf16 (!%p261_p2), %v1105_v3, %v1104_v2  ;;  %v2424_v17 = vpack.c.bf16 (!%p261_p2), %v1107_v10, %v1106_v9  ;;  %v1109_v19 = vld [vmem:[%s2941_s5 + $0x28] sm:$0xff] (!%p261_p2)  ;;  %v1110_v25 = vld [vmem:[%s2941_s5 + $0x30] sm:$0xff] (!%p261_p2)  ;;  %vm1115_vm7 = vcmask (!%p261_p2), 719872   ;;  %vm1797_vm8 = vcmask (!%p261_p2), 179200  }
   0x9   : > { %v2440_v7 = vpack.c.bf16 (!%p261_p2), %v1438_v6, %v1437_v4  ;;  %v1108_v18 = vld [vmem:[%s2941_s5 + $0x20] sm:$0xff] (!%p261_p2)  ;;  %v1111_v26 = vld [vmem:[%s2941_s5 + $0x38] sm:$0xff] (!%p261_p2)  ;;  %v1113_v33 = vld [vmem:[%s2941_s5 + $0x48] sm:$0xff] (!%p261_p2) }
   0xa   : > { %2421 = vmatprep.subr.bf16.mxu0 (!%p261_p2), %v2420_v5  ;;  %v2428_v24 = vpack.c.bf16 (!%p261_p2), %v1109_v19, %v1108_v18  ;;  %v2432_v31 = vpack.c.bf16 (!%p261_p2), %v1111_v26, %v1110_v25  ;;  %v1112_v32 = vld [vmem:[%s2941_s5 + $0x40] sm:$0xff] (!%p261_p2)  ;;  %v1114_v43 = vld [vmem:[%s2941_s5 + $0x50] sm:$0xff] (!%p261_p2) }
   0xb   : > { %2442 = vmatprep.subr.msk.bf16.mxu1 (!%p261_p2), %vm2530_vm3, %v2440_v7  ;;  %v2436_v38 = vpack.c.bf16 (!%p261_p2), %v1113_v33, %v1112_v32 }
   0xd   : > { %s2947_s30 = smov (!%p303_p3, %s1915_s30), 63 }
   0xe   : > { %s2534_s16 = sshll.u32 %s2947_s30, 3 }
   0xf   : > { %s2548_s23 = scalar_lea.vmem %s2936_s0, %s2534_s16  ;;  %s2554_s27 = scalar_lea.vmem %s2937_s1, %s2534_s16 }
  0x10   : > { %v326_v11 = vld [vmem:[%s2548_s23] sm:$0xff]  ;;  %v327_v13 = vld [vmem:[%s2548_s23 + $0x8] sm:$0xff]  ;;  %v328_v15 = vld [vmem:[%s2548_s23 + $0x10] sm:$0xff]  ;;  %s2711_s22 = scalar_lea.vmem %s2938_s2, %s2534_s16  ;;  %s2849_s26 = scalar_lea.vmem %s2943_s7, %s2534_s16 }
  0x11   : > { %v358_v12 = vld [vmem:[%s2554_s27] sm:$0xff]  ;;  %2200 = vmatprep.mubr.msk.f32.mxu0 %vm423_vm4, %v326_v11  ;;  %v359_v14 = vld [vmem:[%s2554_s27 + $0x8] sm:$0xff]  ;;  %v360_v16 = vld [vmem:[%s2554_s27 + $0x10] sm:$0xff] }
  0x12   : > { %2250 = vmatprep.mubr.msk.f32.mxu1 %vm746_vm5, %v358_v12  ;;  %2201 = vmatmul.mubr.msk.f32.vlgmr.msra.gmra.mrb[0].mxu0 %vm423_vm4, %v327_v13  ;;  %v329_v20 = vld [vmem:[%s2548_s23 + $0x18] sm:$0xff]  ;;  %v330_v22 = vld [vmem:[%s2548_s23 + $0x20] sm:$0xff]  ;;  %v331_v27 = vld [vmem:[%s2548_s23 + $0x28] sm:$0xff] }
  0x13   : > { %2251 = vmatmul.mubr.msk.f32.vlgmr.msra.gmra.mrb[0].mxu1 %vm746_vm5, %v359_v14  ;;  %2203 = vmatprep.mubr.msk.f32.mxu0 %vm423_vm4, %v328_v15  ;;  %v361_v21 = vld [vmem:[%s2554_s27 + $0x18] sm:$0xff]  ;;  %v362_v23 = vld [vmem:[%s2554_s27 + $0x20] sm:$0xff]  ;;  %v363_v28 = vld [vmem:[%s2554_s27 + $0x28] sm:$0xff] }
  0x14   : > { %2253 = vmatprep.mubr.msk.f32.mxu1 %vm746_vm5, %v360_v16  ;;  %2423 = vmatpush3.bf16.msra.mxu0 %v2420_v5  ;;  %v332_v29 = vld [vmem:[%s2548_s23 + $0x30] sm:$0xff]  ;;  %v333_v34 = vld [vmem:[%s2548_s23 + $0x38] sm:$0xff]  ;;  %v334_v36 = vld [vmem:[%s2548_s23 + $0x40] sm:$0xff] }
  0x15   : > { %2445 = vmatpush3.bf16.msk.msra.mxu1 %vm2530_vm3, %v2440_v7  ;;  %2425 = vmatprep.subr.bf16.mxu0 %v2424_v17  ;;  %v364_v30 = vld [vmem:[%s2554_s27 + $0x30] sm:$0xff]  ;;  %v365_v35 = vld [vmem:[%s2554_s27 + $0x38] sm:$0xff]  ;;  %v366_v37 = vld [vmem:[%s2554_s27 + $0x40] sm:$0xff] }
  0x16   : > { %2204 = vmatmul.mubr.msk.f32.gmra.mrb[2].mxu0 %vm423_vm4, %v329_v20  ;;  %v335_v39 = vld [vmem:[%s2548_s23 + $0x48] sm:$0xff]  ;;  %v336_v41 = vld [vmem:[%s2548_s23 + $0x50] sm:$0xff]  ;;  %v337_v44 = vld [vmem:[%s2548_s23 + $0x58] sm:$0xff] }
  0x17   : > { %2254 = vmatmul.mubr.msk.f32.gmra.mrb[2].mxu1 %vm746_vm5, %v361_v21  ;;  %2206 = vmatprep.mubr.msk.f32.mxu0 %vm423_vm4, %v330_v22  ;;  %v367_v40 = vld [vmem:[%s2554_s27 + $0x48] sm:$0xff]  ;;  %v368_v42 = vld [vmem:[%s2554_s27 + $0x50] sm:$0xff]  ;;  %v369_v45 = vld [vmem:[%s2554_s27 + $0x58] sm:$0xff] }
  0x18   : > { %2256 = vmatprep.mubr.msk.f32.mxu1 %vm746_vm5, %v362_v23  ;;  %2427 = vmatpush3.bf16.msra.mxu0 %v2424_v17  ;;  %v338_v46 = vld [vmem:[%s2548_s23 + $0x60] sm:$0xff]  ;;  %v339_v48 = vld [vmem:[%s2548_s23 + $0x68] sm:$0xff]  ;;  %v340_v50 = vld [vmem:[%s2548_s23 + $0x70] sm:$0xff] }
  0x19   : > { %2429 = vmatprep.subr.bf16.mxu0 %v2428_v24  ;;  %v370_v47 = vld [vmem:[%s2554_s27 + $0x60] sm:$0xff]  ;;  %v371_v49 = vld [vmem:[%s2554_s27 + $0x68] sm:$0xff]  ;;  %v372_v51 = vld [vmem:[%s2554_s27 + $0x70] sm:$0xff] }
  0x1a   : > { %2207 = vmatmul.mubr.msk.f32.gmra.mrb[4].mxu0 %vm423_vm4, %v331_v27  ;;  %v341_v52 = vld [vmem:[%s2548_s23 + $0x78] sm:$0xff]  ;;  %v342_v54 = vld [vmem:[%s2548_s23 + $0x80] sm:$0xff]  ;;  %v343_v56 = vld [vmem:[%s2548_s23 + $0x88] sm:$0xff] }
  0x1b   : > { %2257 = vmatmul.mubr.msk.f32.gmra.mrb[4].mxu1 %vm746_vm5, %v363_v28  ;;  %2209 = vmatprep.mubr.msk.f32.mxu0 %vm423_vm4, %v332_v29  ;;  %v373_v53 = vld [vmem:[%s2554_s27 + $0x78] sm:$0xff]  ;;  %v374_v55 = vld [vmem:[%s2554_s27 + $0x80] sm:$0xff]  ;;  %v375_v57 = vld [vmem:[%s2554_s27 + $0x88] sm:$0xff] }
  0x1c   : > { %2259 = vmatprep.mubr.msk.f32.mxu1 %vm746_vm5, %v364_v30  ;;  %2431 = vmatpush3.bf16.msra.mxu0 %v2428_v24  ;;  %v344_v58 = vld [vmem:[%s2548_s23 + $0x90] sm:$0xff]  ;;  %v345_v60 = vld [vmem:[%s2548_s23 + $0x98] sm:$0xff]  ;;  %v346_v62 = vld [vmem:[%s2548_s23 + $0xa0] sm:$0xff] }
  0x1d   : > { %2433 = vmatprep.subr.bf16.mxu0 %v2432_v31  ;;  %v376_v59 = vld [vmem:[%s2554_s27 + $0x90] sm:$0xff]  ;;  %v377_v61 = vld [vmem:[%s2554_s27 + $0x98] sm:$0xff]  ;;  %v378_v63 = vld [vmem:[%s2554_s27 + $0xa0] sm:$0xff] }
  0x1e   : > { %2210 = vmatmul.mubr.msk.f32.gmra.mrb[6].mxu0 %vm423_vm4, %v333_v34  ;;  %v347_v0 = vld [vmem:[%s2548_s23 + $0xa8] sm:$0xff]  ;;  %v348_v2 = vld [vmem:[%s2548_s23 + $0xb0] sm:$0xff]  ;;  %v349_v4 = vld [vmem:[%s2548_s23 + $0xb8] sm:$0xff] }
  0x1f   : > { %2260 = vmatmul.mubr.msk.f32.gmra.mrb[6].mxu1 %vm746_vm5, %v365_v35  ;;  %2212 = vmatprep.mubr.msk.f32.mxu0 %vm423_vm4, %v334_v36  ;;  %v379_v1 = vld [vmem:[%s2554_s27 + $0xa8] sm:$0xff]  ;;  %v380_v3 = vld [vmem:[%s2554_s27 + $0xb0] sm:$0xff]  ;;  %v381_v5 = vld [vmem:[%s2554_s27 + $0xb8] sm:$0xff] }
  0x20   : > { %2262 = vmatprep.mubr.msk.f32.mxu1 %vm746_vm5, %v366_v37  ;;  %2435 = vmatpush3.bf16.msra.mxu0 %v2432_v31  ;;  %v350_v6 = vld [vmem:[%s2548_s23 + $0xc0] sm:$0xff]  ;;  %v351_v8 = vld [vmem:[%s2548_s23 + $0xc8] sm:$0xff]  ;;  %v352_v10 = vld [vmem:[%s2548_s23 + $0xd0] sm:$0xff] }
  0x21   : > { %2437 = vmatprep.subr.bf16.mxu0 %v2436_v38  ;;  %v382_v7 = vld [vmem:[%s2554_s27 + $0xc0] sm:$0xff]  ;;  %v383_v9 = vld [vmem:[%s2554_s27 + $0xc8] sm:$0xff]  ;;  %v384_v11 = vld [vmem:[%s2554_s27 + $0xd0] sm:$0xff] }
  0x22   : > { %2213 = vmatmul.mubr.msk.f32.gmra.mrb[8].mxu0 %vm423_vm4, %v335_v39  ;;  %v353_v12 = vld [vmem:[%s2548_s23 + $0xd8] sm:$0xff]  ;;  %v354_v14 = vld [vmem:[%s2548_s23 + $0xe0] sm:$0xff]  ;;  %v355_v16 = vld [vmem:[%s2548_s23 + $0xe8] sm:$0xff] }
  0x23   : > { %2263 = vmatmul.mubr.msk.f32.gmra.mrb[8].mxu1 %vm746_vm5, %v367_v40  ;;  %2215 = vmatprep.mubr.msk.f32.mxu0 %vm423_vm4, %v336_v41  ;;  %v385_v13 = vld [vmem:[%s2554_s27 + $0xd8] sm:$0xff]  ;;  %v386_v15 = vld [vmem:[%s2554_s27 + $0xe0] sm:$0xff]  ;;  %v387_v17 = vld [vmem:[%s2554_s27 + $0xe8] sm:$0xff] }
  0x24   : > { %2265 = vmatprep.mubr.msk.f32.mxu1 %vm746_vm5, %v368_v42  ;;  %2439 = vmatpush3.bf16.msra.mxu0 %v2436_v38  ;;  %v356_v18 = vld [vmem:[%s2548_s23 + $0xf0] sm:$0xff]  ;;  %v357_v20 = vld [vmem:[%s2548_s23 + $0xf8] sm:$0xff]  ;;  %v390_v22 = vld [vmem:[%s2711_s22] sm:$0xff] }
  0x25   : > { %2318 = vmatprep.subr.mxu0 %v1114_v43  ;;  %v388_v19 = vld [vmem:[%s2554_s27 + $0xf0] sm:$0xff]  ;;  %v389_v21 = vld [vmem:[%s2554_s27 + $0xf8] sm:$0xff]  ;;  %v391_v23 = vld [vmem:[%s2711_s22 + $0x8] sm:$0xff] }
  0x26   : > { %2216 = vmatmul.mubr.msk.f32.gmra.mrb[10].mxu0 %vm423_vm4, %v337_v44  ;;  %v392_v24 = vld [vmem:[%s2711_s22 + $0x10] sm:$0xff]  ;;  %v393_v25 = vld [vmem:[%s2711_s22 + $0x18] sm:$0xff]  ;;  %v394_v26 = vld [vmem:[%s2711_s22 + $0x20] sm:$0xff] }
  0x27   : > { %2266 = vmatmul.mubr.msk.f32.gmra.mrb[10].mxu1 %vm746_vm5, %v369_v45  ;;  %2218 = vmatprep.mubr.msk.f32.mxu0 %vm423_vm4, %v338_v46  ;;  %v395_v27 = vld [vmem:[%s2711_s22 + $0x28] sm:$0xff]  ;;  %v396_v28 = vld [vmem:[%s2711_s22 + $0x30] sm:$0xff]  ;;  %v397_v29 = vld [vmem:[%s2711_s22 + $0x38] sm:$0xff] }
  0x28   : > { %2268 = vmatprep.mubr.msk.f32.mxu1 %vm746_vm5, %v370_v47  ;;  %2319 = vmatpush3.msra.mxu0 %v1114_v43  ;;  %v398_v30 = vld [vmem:[%s2711_s22 + $0x40] sm:$0xff]  ;;  %v399_v31 = vld [vmem:[%s2711_s22 + $0x48] sm:$0xff]  ;;  %v400_v32 = vld [vmem:[%s2711_s22 + $0x50] sm:$0xff] }
  0x29   : > { %v401_v33 = vld [vmem:[%s2711_s22 + $0x58] sm:$0xff]  ;;  %v402_v34 = vld [vmem:[%s2711_s22 + $0x60] sm:$0xff]  ;;  %v403_v35 = vld [vmem:[%s2711_s22 + $0x68] sm:$0xff] }
  0x2a   : > { %2219 = vmatmul.mubr.msk.f32.gmra.mrb[12].mxu0 %vm423_vm4, %v339_v48  ;;  %v404_v36 = vld [vmem:[%s2711_s22 + $0x70] sm:$0xff]  ;;  %v405_v37 = vld [vmem:[%s2711_s22 + $0x78] sm:$0xff]  ;;  %v406_v38 = vld [vmem:[%s2711_s22 + $0x80] sm:$0xff] }
  0x2b   : > { %2269 = vmatmul.mubr.msk.f32.gmra.mrb[12].mxu1 %vm746_vm5, %v371_v49  ;;  %2221 = vmatprep.mubr.msk.f32.mxu0 %vm423_vm4, %v340_v50  ;;  %v407_v39 = vld [vmem:[%s2711_s22 + $0x88] sm:$0xff]  ;;  %v408_v40 = vld [vmem:[%s2711_s22 + $0x90] sm:$0xff]  ;;  %v409_v41 = vld [vmem:[%s2711_s22 + $0x98] sm:$0xff] }
  0x2c   : > { %2271 = vmatprep.mubr.msk.f32.mxu1 %vm746_vm5, %v372_v51  ;;  %v410_v42 = vld [vmem:[%s2711_s22 + $0xa0] sm:$0xff]  ;;  %v411_v43 = vld [vmem:[%s2711_s22 + $0xa8] sm:$0xff]  ;;  %v412_v44 = vld [vmem:[%s2711_s22 + $0xb0] sm:$0xff] }
  0x2d   : > { %v413_v45 = vld [vmem:[%s2711_s22 + $0xb8] sm:$0xff]  ;;  %v414_v46 = vld [vmem:[%s2711_s22 + $0xc0] sm:$0xff]  ;;  %v415_v47 = vld [vmem:[%s2711_s22 + $0xc8] sm:$0xff] }
  0x2e   : > { %2222 = vmatmul.mubr.msk.f32.gmra.mrb[14].mxu0 %vm423_vm4, %v341_v52  ;;  %v416_v48 = vld [vmem:[%s2711_s22 + $0xd0] sm:$0xff]  ;;  %v417_v49 = vld [vmem:[%s2711_s22 + $0xd8] sm:$0xff]  ;;  %v418_v50 = vld [vmem:[%s2711_s22 + $0xe0] sm:$0xff] }
  0x2f   : > { %2272 = vmatmul.mubr.msk.f32.gmra.mrb[14].mxu1 %vm746_vm5, %v373_v53  ;;  %2224 = vmatprep.mubr.msk.f32.mxu0 %vm423_vm4, %v342_v54  ;;  %v419_v51 = vld [vmem:[%s2711_s22 + $0xe8] sm:$0xff]  ;;  %v420_v52 = vld [vmem:[%s2711_s22 + $0xf0] sm:$0xff]  ;;  %v421_v53 = vld [vmem:[%s2711_s22 + $0xf8] sm:$0xff] }
  0x30   : > { %2274 = vmatprep.mubr.msk.f32.mxu1 %vm746_vm5, %v374_v55 }
  0x32   : > { %2225 = vmatmul.mubr.msk.f32.gmra.mrb[16].mxu0 %vm423_vm4, %v343_v56 }
  0x33   : > { %2275 = vmatmul.mubr.msk.f32.gmra.mrb[16].mxu1 %vm746_vm5, %v375_v57  ;;  %2227 = vmatprep.mubr.msk.f32.mxu0 %vm423_vm4, %v344_v58 }
  0x34   : > { %2277 = vmatprep.mubr.msk.f32.mxu1 %vm746_vm5, %v376_v59 }
  0x36   : > { %2228 = vmatmul.mubr.msk.f32.gmra.mrb[18].mxu0 %vm423_vm4, %v345_v60 }
  0x37   : > { %2278 = vmatmul.mubr.msk.f32.gmra.mrb[18].mxu1 %vm746_vm5, %v377_v61  ;;  %2230 = vmatprep.mubr.msk.f32.mxu0 %vm423_vm4, %v346_v62 }
  0x38   : > { %2280 = vmatprep.mubr.msk.f32.mxu1 %vm746_vm5, %v378_v63 }
  0x3a   : > { %2231 = vmatmul.mubr.msk.f32.gmra.mrb[20].mxu0 %vm423_vm4, %v347_v0 }
  0x3b   : > { %2281 = vmatmul.mubr.msk.f32.gmra.mrb[20].mxu1 %vm746_vm5, %v379_v1  ;;  %2233 = vmatprep.mubr.msk.f32.mxu0 %vm423_vm4, %v348_v2 }
  0x3c   : > { %2283 = vmatprep.mubr.msk.f32.mxu1 %vm746_vm5, %v380_v3 }
  0x3e   : > { %2234 = vmatmul.mubr.msk.f32.gmra.mrb[22].mxu0 %vm423_vm4, %v349_v4 }
  0x3f   : > { %2284 = vmatmul.mubr.msk.f32.gmra.mrb[22].mxu1 %vm746_vm5, %v381_v5  ;;  %2236 = vmatprep.mubr.msk.f32.mxu0 %vm423_vm4, %v350_v6 }
  0x40   : > { %2286 = vmatprep.mubr.msk.f32.mxu1 %vm746_vm5, %v382_v7 }
  0x42   : > { %2237 = vmatmul.mubr.msk.f32.gmra.mrb[24].mxu0 %vm423_vm4, %v351_v8 }
  0x43   : > { %2287 = vmatmul.mubr.msk.f32.gmra.mrb[24].mxu1 %vm746_vm5, %v383_v9  ;;  %2239 = vmatprep.mubr.msk.f32.mxu0 %vm423_vm4, %v352_v10 }
  0x44   : > { %2289 = vmatprep.mubr.msk.f32.mxu1 %vm746_vm5, %v384_v11 }
  0x46   : > { %2240 = vmatmul.mubr.msk.f32.gmra.mrb[26].mxu0 %vm423_vm4, %v353_v12 }
  0x47   : > { %2290 = vmatmul.mubr.msk.f32.gmra.mrb[26].mxu1 %vm746_vm5, %v385_v13  ;;  %2242 = vmatprep.mubr.msk.f32.mxu0 %vm423_vm4, %v354_v14 }
  0x48   : > { %2292 = vmatprep.mubr.msk.f32.mxu1 %vm746_vm5, %v386_v15 }
  0x4a   : > { %2243 = vmatmul.mubr.msk.f32.gmra.mrb[28].mxu0 %vm423_vm4, %v355_v16 }
  0x4b   : > { %2293 = vmatmul.mubr.msk.f32.gmra.mrb[28].mxu1 %vm746_vm5, %v387_v17  ;;  %2245 = vmatprep.mubr.msk.f32.mxu0 %vm423_vm4, %v356_v18 }
  0x4c   : > { %2295 = vmatprep.mubr.msk.f32.mxu1 %vm746_vm5, %v388_v19 }
  0x4e   : > { %2246 = vmatmul.mubr.msk.f32.gmra.mrb[30].mxu0 %vm423_vm4, %v357_v20 }
  0x4f   : > { %2296 = vmatmul.mubr.msk.f32.gmra.mrb[30].mxu1 %vm746_vm5, %v389_v21 }
  0x50   : > { %2372 = vmatprep.mubr.msk.f32.mxu1 %vm1439_vm6, %v390_v22 }
  0x53   : > { %2373 = vmatmul.mubr.msk.f32.vlgmr.msra.gmra.mrb[32].mxu1 %vm1439_vm6, %v391_v23 }
  0x54   : > { %2375 = vmatprep.mubr.msk.f32.mxu1 %vm1439_vm6, %v392_v24 }
  0x57   : > { %2376 = vmatmul.mubr.msk.f32.gmra.mrb[34].mxu1 %vm1439_vm6, %v393_v25 }
  0x58   : > { %2378 = vmatprep.mubr.msk.f32.mxu1 %vm1439_vm6, %v394_v26 }
  0x5b   : > { %2379 = vmatmul.mubr.msk.f32.gmra.mrb[36].mxu1 %vm1439_vm6, %v395_v27 }
  0x5c   : > { %2381 = vmatprep.mubr.msk.f32.mxu1 %vm1439_vm6, %v396_v28 }
  0x5f   : > { %2382 = vmatmul.mubr.msk.f32.gmra.mrb[38].mxu1 %vm1439_vm6, %v397_v29 }
  0x60   : > { %2384 = vmatprep.mubr.msk.f32.mxu1 %vm1439_vm6, %v398_v30 }
  0x63   : > { %2385 = vmatmul.mubr.msk.f32.gmra.mrb[40].mxu1 %vm1439_vm6, %v399_v31 }
  0x64   : > { %2387 = vmatprep.mubr.msk.f32.mxu1 %vm1439_vm6, %v400_v32 }
  0x67   : > { %2388 = vmatmul.mubr.msk.f32.gmra.mrb[42].mxu1 %vm1439_vm6, %v401_v33 }
  0x68   : > { %2390 = vmatprep.mubr.msk.f32.mxu1 %vm1439_vm6, %v402_v34 }
  0x6b   : > { %2391 = vmatmul.mubr.msk.f32.gmra.mrb[44].mxu1 %vm1439_vm6, %v403_v35 }
  0x6c   : > { %2393 = vmatprep.mubr.msk.f32.mxu1 %vm1439_vm6, %v404_v36 }
  0x6f   : > { %2394 = vmatmul.mubr.msk.f32.gmra.mrb[46].mxu1 %vm1439_vm6, %v405_v37 }
  0x70   : > { %2396 = vmatprep.mubr.msk.f32.mxu1 %vm1439_vm6, %v406_v38 }
  0x73   : > { %2397 = vmatmul.mubr.msk.f32.gmra.mrb[48].mxu1 %vm1439_vm6, %v407_v39 }
  0x74   : > { %2399 = vmatprep.mubr.msk.f32.mxu1 %vm1439_vm6, %v408_v40 }
  0x77   : > { %2400 = vmatmul.mubr.msk.f32.gmra.mrb[50].mxu1 %vm1439_vm6, %v409_v41 }
  0x78   : > { %2402 = vmatprep.mubr.msk.f32.mxu1 %vm1439_vm6, %v410_v42 }
  0x7b   : > { %2403 = vmatmul.mubr.msk.f32.gmra.mrb[52].mxu1 %vm1439_vm6, %v411_v43 }
  0x7c   : > { %2405 = vmatprep.mubr.msk.f32.mxu1 %vm1439_vm6, %v412_v44 }
  0x7f   : > { %2406 = vmatmul.mubr.msk.f32.gmra.mrb[54].mxu1 %vm1439_vm6, %v413_v45 }
  0x80   : > { %2408 = vmatprep.mubr.msk.f32.mxu1 %vm1439_vm6, %v414_v46 }
  0x83   : > { %2409 = vmatmul.mubr.msk.f32.gmra.mrb[56].mxu1 %vm1439_vm6, %v415_v47 }
  0x84   : > { %2411 = vmatprep.mubr.msk.f32.mxu1 %vm1439_vm6, %v416_v48 }
  0x87   : > { %2412 = vmatmul.mubr.msk.f32.gmra.mrb[58].mxu1 %vm1439_vm6, %v417_v49 }
  0x88   : > { %2414 = vmatprep.mubr.msk.f32.mxu1 %vm1439_vm6, %v418_v50 }
  0x8b   : > { %2415 = vmatmul.mubr.msk.f32.gmra.mrb[60].mxu1 %vm1439_vm6, %v419_v51 }
  0x8c   : > { %2417 = vmatprep.mubr.msk.f32.mxu1 %vm1439_vm6, %v420_v52 }
  0x8f   : > { %2418 = vmatmul.mubr.msk.f32.gmra.mrb[62].mxu1 %vm1439_vm6, %v421_v53 }
  0xe5   : > { %v2202_v54 = vpop.f32.mrb[0].mxu0 }
  0xe6   : > { %v2252_v55 = vpop.f32.mrb[0].mxu1  ;;  %v586_v57 = vpop.f32.mrb[1].mxu0 }
  0xe7   : > { %v1073_v56 = vmul.f32 %v2252_v55, %v2202_v54  ;;  %v913_v58 = vpop.f32.mrb[1].mxu1 }
  0xe8   : > { %v1072_v59 = vmul.f32 %v913_v58, %v586_v57 }
  0xe9   : > { %v2205_v60 = vpop.f32.mrb[2].mxu0 }
  0xea   : > { %v2255_v61 = vpop.f32.mrb[2].mxu1  ;;  %2320 = vmatprep.mubr.msk.f32.mxu0 %vm1115_vm7, %v1072_v59  ;;  %v596_v63 = vpop.f32.mrb[3].mxu0 }
  0xeb   : > { %v1075_v62 = vmul.f32 %v2255_v61, %v2205_v60  ;;  %v923_v0 = vpop.f32.mrb[3].mxu1  ;;  %2321 = vmatmul.mubr.msk.f32.vlgmr.msra.gmra.mrb[32].mxu0 %vm1115_vm7, %v1073_v56 }
  0xec   : > { %v1074_v1 = vmul.f32 %v923_v0, %v596_v63 }
  0xed   : > { %v2208_v2 = vpop.f32.mrb[4].mxu0 }
  0xee   : > { %v2258_v3 = vpop.f32.mrb[4].mxu1  ;;  %2323 = vmatprep.mubr.msk.f32.mxu0 %vm1115_vm7, %v1074_v1  ;;  %v606_v5 = vpop.f32.mrb[5].mxu0 }
  0xef   : > { %v1077_v4 = vmul.f32 %v2258_v3, %v2208_v2  ;;  %v933_v6 = vpop.f32.mrb[5].mxu1  ;;  %2324 = vmatmul.mubr.msk.f32.gmra.mrb[34].mxu0 %vm1115_vm7, %v1075_v62 }
  0xf0   : > { %v1076_v7 = vmul.f32 %v933_v6, %v606_v5 }
  0xf1   : > { %v2211_v8 = vpop.f32.mrb[6].mxu0 }
  0xf2   : > { %v2261_v9 = vpop.f32.mrb[6].mxu1  ;;  %2326 = vmatprep.mubr.msk.f32.mxu0 %vm1115_vm7, %v1076_v7  ;;  %v616_v11 = vpop.f32.mrb[7].mxu0 }
  0xf3   : > { %v1079_v10 = vmul.f32 %v2261_v9, %v2211_v8  ;;  %v943_v12 = vpop.f32.mrb[7].mxu1  ;;  %2327 = vmatmul.mubr.msk.f32.gmra.mrb[36].mxu0 %vm1115_vm7, %v1077_v4 }
  0xf4   : > { %v1078_v13 = vmul.f32 %v943_v12, %v616_v11 }
  0xf5   : > { %v2214_v14 = vpop.f32.mrb[8].mxu0 }
  0xf6   : > { %v2264_v15 = vpop.f32.mrb[8].mxu1  ;;  %2329 = vmatprep.mubr.msk.f32.mxu0 %vm1115_vm7, %v1078_v13  ;;  %v626_v17 = vpop.f32.mrb[9].mxu0 }
  0xf7   : > { %v1081_v16 = vmul.f32 %v2264_v15, %v2214_v14  ;;  %v953_v18 = vpop.f32.mrb[9].mxu1  ;;  %2330 = vmatmul.mubr.msk.f32.gmra.mrb[38].mxu0 %vm1115_vm7, %v1079_v10 }
  0xf8   : > { %v1080_v19 = vmul.f32 %v953_v18, %v626_v17 }
  0xf9   : > { %v2217_v20 = vpop.f32.mrb[10].mxu0 }
  0xfa   : > { %v2267_v21 = vpop.f32.mrb[10].mxu1  ;;  %2332 = vmatprep.mubr.msk.f32.mxu0 %vm1115_vm7, %v1080_v19  ;;  %v636_v23 = vpop.f32.mrb[11].mxu0 }
  0xfb   : > { %v1083_v22 = vmul.f32 %v2267_v21, %v2217_v20  ;;  %v963_v24 = vpop.f32.mrb[11].mxu1  ;;  %2333 = vmatmul.mubr.msk.f32.gmra.mrb[40].mxu0 %vm1115_vm7, %v1081_v16 }
  0xfc   : > { %v1082_v25 = vmul.f32 %v963_v24, %v636_v23 }
  0xfd   : > { %v2220_v26 = vpop.f32.mrb[12].mxu0 }
  0xfe   : > { %v2270_v27 = vpop.f32.mrb[12].mxu1  ;;  %2335 = vmatprep.mubr.msk.f32.mxu0 %vm1115_vm7, %v1082_v25  ;;  %v646_v29 = vpop.f32.mrb[13].mxu0 }
  0xff   : > { %v1085_v28 = vmul.f32 %v2270_v27, %v2220_v26  ;;  %v973_v30 = vpop.f32.mrb[13].mxu1  ;;  %2336 = vmatmul.mubr.msk.f32.gmra.mrb[42].mxu0 %vm1115_vm7, %v1083_v22 }
 0x100   : > { %v1084_v31 = vmul.f32 %v973_v30, %v646_v29 }
 0x101   : > { %v2223_v32 = vpop.f32.mrb[14].mxu0 }
 0x102   : > { %v2273_v33 = vpop.f32.mrb[14].mxu1  ;;  %2338 = vmatprep.mubr.msk.f32.mxu0 %vm1115_vm7, %v1084_v31  ;;  %v656_v35 = vpop.f32.mrb[15].mxu0 }
 0x103   : > { %v1087_v34 = vmul.f32 %v2273_v33, %v2223_v32  ;;  %v983_v36 = vpop.f32.mrb[15].mxu1  ;;  %2339 = vmatmul.mubr.msk.f32.gmra.mrb[44].mxu0 %vm1115_vm7, %v1085_v28 }
 0x104   : > { %v1086_v37 = vmul.f32 %v983_v36, %v656_v35 }
 0x105   : > { %v2226_v38 = vpop.f32.mrb[16].mxu0 }
 0x106   : > { %v2276_v39 = vpop.f32.mrb[16].mxu1  ;;  %2341 = vmatprep.mubr.msk.f32.mxu0 %vm1115_vm7, %v1086_v37  ;;  %v666_v41 = vpop.f32.mrb[17].mxu0 }
 0x107   : > { %v1089_v40 = vmul.f32 %v2276_v39, %v2226_v38  ;;  %v993_v42 = vpop.f32.mrb[17].mxu1  ;;  %2342 = vmatmul.mubr.msk.f32.gmra.mrb[46].mxu0 %vm1115_vm7, %v1087_v34 }
 0x108   : > { %v1088_v43 = vmul.f32 %v993_v42, %v666_v41 }
 0x109   : > { %v2229_v44 = vpop.f32.mrb[18].mxu0 }
 0x10a   : > { %v2279_v45 = vpop.f32.mrb[18].mxu1  ;;  %2344 = vmatprep.mubr.msk.f32.mxu0 %vm1115_vm7, %v1088_v43  ;;  %v676_v47 = vpop.f32.mrb[19].mxu0 }
 0x10b   : > { %v1091_v46 = vmul.f32 %v2279_v45, %v2229_v44  ;;  %v1003_v48 = vpop.f32.mrb[19].mxu1  ;;  %2345 = vmatmul.mubr.msk.f32.gmra.mrb[48].mxu0 %vm1115_vm7, %v1089_v40 }
 0x10c   : > { %v1090_v49 = vmul.f32 %v1003_v48, %v676_v47 }
 0x10d   : > { %v2232_v50 = vpop.f32.mrb[20].mxu0 }
 0x10e   : > { %v2282_v51 = vpop.f32.mrb[20].mxu1  ;;  %2347 = vmatprep.mubr.msk.f32.mxu0 %vm1115_vm7, %v1090_v49  ;;  %v686_v53 = vpop.f32.mrb[21].mxu0 }
 0x10f   : > { %v1093_v52 = vmul.f32 %v2282_v51, %v2232_v50  ;;  %v1013_v54 = vpop.f32.mrb[21].mxu1  ;;  %2348 = vmatmul.mubr.msk.f32.gmra.mrb[50].mxu0 %vm1115_vm7, %v1091_v46 }
 0x110   : > { %v1092_v55 = vmul.f32 %v1013_v54, %v686_v53 }
 0x111   : > { %v2235_v56 = vpop.f32.mrb[22].mxu0 }
 0x112   : > { %v2285_v57 = vpop.f32.mrb[22].mxu1  ;;  %2350 = vmatprep.mubr.msk.f32.mxu0 %vm1115_vm7, %v1092_v55  ;;  %v696_v59 = vpop.f32.mrb[23].mxu0 }
 0x113   : > { %v1095_v58 = vmul.f32 %v2285_v57, %v2235_v56  ;;  %v1023_v60 = vpop.f32.mrb[23].mxu1  ;;  %2351 = vmatmul.mubr.msk.f32.gmra.mrb[52].mxu0 %vm1115_vm7, %v1093_v52 }
 0x114   : > { %v1094_v61 = vmul.f32 %v1023_v60, %v696_v59 }
 0x115   : > { %v2238_v62 = vpop.f32.mrb[24].mxu0 }
 0x116   : > { %v2288_v63 = vpop.f32.mrb[24].mxu1  ;;  %2353 = vmatprep.mubr.msk.f32.mxu0 %vm1115_vm7, %v1094_v61  ;;  %v706_v1 = vpop.f32.mrb[25].mxu0 }
 0x117   : > { %v1097_v0 = vmul.f32 %v2288_v63, %v2238_v62  ;;  %v1033_v2 = vpop.f32.mrb[25].mxu1  ;;  %2354 = vmatmul.mubr.msk.f32.gmra.mrb[54].mxu0 %vm1115_vm7, %v1095_v58 }
 0x118   : > { %v1096_v3 = vmul.f32 %v1033_v2, %v706_v1 }
 0x119   : > { %v2241_v4 = vpop.f32.mrb[26].mxu0 }
 0x11a   : > { %v2291_v5 = vpop.f32.mrb[26].mxu1  ;;  %2356 = vmatprep.mubr.msk.f32.mxu0 %vm1115_vm7, %v1096_v3  ;;  %v716_v7 = vpop.f32.mrb[27].mxu0 }
 0x11b   : > { %v1099_v6 = vmul.f32 %v2291_v5, %v2241_v4  ;;  %v1043_v8 = vpop.f32.mrb[27].mxu1  ;;  %2357 = vmatmul.mubr.msk.f32.gmra.mrb[56].mxu0 %vm1115_vm7, %v1097_v0 }
 0x11c   : > { %v1098_v9 = vmul.f32 %v1043_v8, %v716_v7 }
 0x11d   : > { %v2244_v10 = vpop.f32.mrb[28].mxu0 }
 0x11e   : > { %v2294_v11 = vpop.f32.mrb[28].mxu1  ;;  %2359 = vmatprep.mubr.msk.f32.mxu0 %vm1115_vm7, %v1098_v9  ;;  %v726_v13 = vpop.f32.mrb[29].mxu0 }
 0x11f   : > { %v1101_v12 = vmul.f32 %v2294_v11, %v2244_v10  ;;  %v1053_v14 = vpop.f32.mrb[29].mxu1  ;;  %2360 = vmatmul.mubr.msk.f32.gmra.mrb[58].mxu0 %vm1115_vm7, %v1099_v6 }
 0x120   : > { %v1100_v15 = vmul.f32 %v1053_v14, %v726_v13 }
 0x121   : > { %v2247_v16 = vpop.f32.mrb[30].mxu0 }
 0x122   : > { %v2297_v17 = vpop.f32.mrb[30].mxu1  ;;  %2362 = vmatprep.mubr.msk.f32.mxu0 %vm1115_vm7, %v1100_v15  ;;  %v736_v19 = vpop.f32.mrb[31].mxu0 }
 0x123   : > { %v1103_v18 = vmul.f32 %v2297_v17, %v2247_v16  ;;  %v1063_v20 = vpop.f32.mrb[31].mxu1  ;;  %2363 = vmatmul.mubr.msk.f32.gmra.mrb[60].mxu0 %vm1115_vm7, %v1101_v12 }
 0x124   : > { %v1102_v21 = vmul.f32 %v1063_v20, %v736_v19 }
 0x126   : > { %2365 = vmatprep.mubr.msk.f32.mxu0 %vm1115_vm7, %v1102_v21  ;;  %v2374_v22 = vpop.f32.mrb[32].mxu1 }
 0x127   : > { %2366 = vmatmul.mubr.msk.f32.gmra.mrb[62].mxu0 %vm1115_vm7, %v1103_v18  ;;  %v1606_v23 = vpop.f32.mrb[33].mxu1 }
 0x12a   : > { %v2377_v24 = vpop.f32.mrb[34].mxu1 }
 0x12b   : > { %v1616_v25 = vpop.f32.mrb[35].mxu1 }
 0x12e   : > { %v2380_v26 = vpop.f32.mrb[36].mxu1 }
 0x12f   : > { %v1626_v27 = vpop.f32.mrb[37].mxu1 }
 0x132   : > { %v2383_v28 = vpop.f32.mrb[38].mxu1 }
 0x133   : > { %v1636_v29 = vpop.f32.mrb[39].mxu1 }
 0x136   : > { %v2386_v30 = vpop.f32.mrb[40].mxu1 }
 0x137   : > { %v1646_v31 = vpop.f32.mrb[41].mxu1 }
 0x13a   : > { %v2389_v32 = vpop.f32.mrb[42].mxu1 }
 0x13b   : > { %v1656_v33 = vpop.f32.mrb[43].mxu1 }
 0x13e   : > { %v2392_v34 = vpop.f32.mrb[44].mxu1 }
 0x13f   : > { %v1666_v35 = vpop.f32.mrb[45].mxu1 }
 0x142   : > { %v2809_v36 = vpop.f32.mrb[46].mxu1 }
 0x143   : > { %v2811_v37 = vpop.f32.mrb[47].mxu1 }
 0x146   : > { %v2813_v38 = vpop.f32.mrb[48].mxu1 }
 0x147   : > { %v2815_v39 = vpop.f32.mrb[49].mxu1 }
 0x14a   : > { %v2817_v40 = vpop.f32.mrb[50].mxu1 }
 0x14b   : > { %v2819_v41 = vpop.f32.mrb[51].mxu1 }
 0x14e   : > { %v2821_v42 = vpop.f32.mrb[52].mxu1 }
 0x14f   : > { %v2823_v43 = vpop.f32.mrb[53].mxu1 }
 0x152   : > { %v2825_v44 = vpop.f32.mrb[54].mxu1 }
 0x153   : > { %v2827_v45 = vpop.f32.mrb[55].mxu1 }
 0x156   : > { %v2829_v46 = vpop.f32.mrb[56].mxu1 }
 0x157   : > { %v2831_v47 = vpop.f32.mrb[57].mxu1 }
 0x15a   : > { %v2833_v48 = vpop.f32.mrb[58].mxu1 }
 0x15b   : > { %v2835_v49 = vpop.f32.mrb[59].mxu1 }
 0x15e   : > { %v2837_v50 = vpop.f32.mrb[60].mxu1 }
 0x15f   : > { %v2839_v51 = vpop.f32.mrb[61].mxu1 }
 0x162   : > { %v2841_v52 = vpop.f32.mrb[62].mxu1 }
 0x163   : > { %v2843_v53 = vpop.f32.mrb[63].mxu1 }
 0x1be   : > { %v2322_v54 = vpop.f32.mrb[32].mxu0 }
 0x1bf   : > { %v1766_v55 = vmul.f32 %v2374_v22, %v2322_v54  ;;  %v1278_v56 = vpop.f32.mrb[33].mxu0 }
 0x1c0   : > { %v1765_v57 = vmul.f32 %v1606_v23, %v1278_v56 }
 0x1c1   : > { %1799 = vst.msk [vmem:[%s2849_s26 + $0x8] sm:$0xff] %vm1797_vm8, %v1766_v55 }
 0x1c2   : > { %1798 = vst.msk [vmem:[%s2849_s26] sm:$0xff] %vm1797_vm8, %v1765_v57  ;;  %v2325_v58 = vpop.f32.mrb[34].mxu0 }
 0x1c3   : > { %v1768_v59 = vmul.f32 %v2377_v24, %v2325_v58  ;;  %v1288_v60 = vpop.f32.mrb[35].mxu0 }
 0x1c4   : > { %v1767_v61 = vmul.f32 %v1616_v25, %v1288_v60 }
 0x1c5   : > { %1801 = vst.msk [vmem:[%s2849_s26 + $0x18] sm:$0xff] %vm1797_vm8, %v1768_v59 }
 0x1c6   : > { %1800 = vst.msk [vmem:[%s2849_s26 + $0x10] sm:$0xff] %vm1797_vm8, %v1767_v61  ;;  %v2328_v62 = vpop.f32.mrb[36].mxu0 }
 0x1c7   : > { %v1770_v63 = vmul.f32 %v2380_v26, %v2328_v62  ;;  %v1298_v0 = vpop.f32.mrb[37].mxu0 }
 0x1c8   : > { %v1769_v1 = vmul.f32 %v1626_v27, %v1298_v0 }
 0x1c9   : > { %1803 = vst.msk [vmem:[%s2849_s26 + $0x28] sm:$0xff] %vm1797_vm8, %v1770_v63 }
 0x1ca   : > { %1802 = vst.msk [vmem:[%s2849_s26 + $0x20] sm:$0xff] %vm1797_vm8, %v1769_v1  ;;  %v2331_v2 = vpop.f32.mrb[38].mxu0 }
 0x1cb   : > { %v1772_v3 = vmul.f32 %v2383_v28, %v2331_v2  ;;  %v1308_v4 = vpop.f32.mrb[39].mxu0 }
 0x1cc   : > { %v1771_v5 = vmul.f32 %v1636_v29, %v1308_v4 }
 0x1cd   : > { %1805 = vst.msk [vmem:[%s2849_s26 + $0x38] sm:$0xff] %vm1797_vm8, %v1772_v3 }
 0x1ce   : > { %1804 = vst.msk [vmem:[%s2849_s26 + $0x30] sm:$0xff] %vm1797_vm8, %v1771_v5  ;;  %v2334_v6 = vpop.f32.mrb[40].mxu0 }
 0x1cf   : > { %v1774_v7 = vmul.f32 %v2386_v30, %v2334_v6  ;;  %v1318_v8 = vpop.f32.mrb[41].mxu0 }
 0x1d0   : > { %v1773_v9 = vmul.f32 %v1646_v31, %v1318_v8 }
 0x1d1   : > { %1807 = vst.msk [vmem:[%s2849_s26 + $0x48] sm:$0xff] %vm1797_vm8, %v1774_v7 }
 0x1d2   : > { %1806 = vst.msk [vmem:[%s2849_s26 + $0x40] sm:$0xff] %vm1797_vm8, %v1773_v9  ;;  %v2337_v10 = vpop.f32.mrb[42].mxu0 }
 0x1d3   : > { %v1776_v11 = vmul.f32 %v2389_v32, %v2337_v10  ;;  %v1328_v12 = vpop.f32.mrb[43].mxu0 }
 0x1d4   : > { %v1775_v13 = vmul.f32 %v1656_v33, %v1328_v12 }
 0x1d5   : > { %1809 = vst.msk [vmem:[%s2849_s26 + $0x58] sm:$0xff] %vm1797_vm8, %v1776_v11 }
 0x1d6   : > { %1808 = vst.msk [vmem:[%s2849_s26 + $0x50] sm:$0xff] %vm1797_vm8, %v1775_v13  ;;  %v2340_v14 = vpop.f32.mrb[44].mxu0 }
 0x1d7   : > { %v1778_v15 = vmul.f32 %v2392_v34, %v2340_v14  ;;  %v1338_v16 = vpop.f32.mrb[45].mxu0 }
 0x1d8   : > { %v1777_v17 = vmul.f32 %v1666_v35, %v1338_v16 }
 0x1d9   : > { %1811 = vst.msk [vmem:[%s2849_s26 + $0x68] sm:$0xff] %vm1797_vm8, %v1778_v15 }
 0x1da   : > { %1810 = vst.msk [vmem:[%s2849_s26 + $0x60] sm:$0xff] %vm1797_vm8, %v1777_v17  ;;  %v2343_v18 = vpop.f32.mrb[46].mxu0 }
 0x1db   : > { %v1780_v19 = vmul.f32 %v2809_v36, %v2343_v18  ;;  %v1348_v20 = vpop.f32.mrb[47].mxu0 }
 0x1dc   : > { %v1779_v21 = vmul.f32 %v2811_v37, %v1348_v20 }
 0x1dd   : > { %1813 = vst.msk [vmem:[%s2849_s26 + $0x78] sm:$0xff] %vm1797_vm8, %v1780_v19 }
 0x1de   : > { %1812 = vst.msk [vmem:[%s2849_s26 + $0x70] sm:$0xff] %vm1797_vm8, %v1779_v21  ;;  %v2346_v22 = vpop.f32.mrb[48].mxu0 }
 0x1df   : > { %v1782_v23 = vmul.f32 %v2813_v38, %v2346_v22  ;;  %v1358_v24 = vpop.f32.mrb[49].mxu0 }
 0x1e0   : > { %v1781_v25 = vmul.f32 %v2815_v39, %v1358_v24 }
 0x1e1   : > { %1815 = vst.msk [vmem:[%s2849_s26 + $0x88] sm:$0xff] %vm1797_vm8, %v1782_v23 }
 0x1e2   : > { %1814 = vst.msk [vmem:[%s2849_s26 + $0x80] sm:$0xff] %vm1797_vm8, %v1781_v25  ;;  %v2349_v26 = vpop.f32.mrb[50].mxu0 }
 0x1e3   : > { %v1784_v27 = vmul.f32 %v2817_v40, %v2349_v26  ;;  %v1368_v28 = vpop.f32.mrb[51].mxu0 }
 0x1e4   : > { %v1783_v29 = vmul.f32 %v2819_v41, %v1368_v28 }
 0x1e5   : > { %1817 = vst.msk [vmem:[%s2849_s26 + $0x98] sm:$0xff] %vm1797_vm8, %v1784_v27 }
 0x1e6   : > { %1816 = vst.msk [vmem:[%s2849_s26 + $0x90] sm:$0xff] %vm1797_vm8, %v1783_v29  ;;  %v2352_v30 = vpop.f32.mrb[52].mxu0 }
 0x1e7   : > { %v1786_v31 = vmul.f32 %v2821_v42, %v2352_v30  ;;  %v1378_v32 = vpop.f32.mrb[53].mxu0 }
 0x1e8   : > { %v1785_v33 = vmul.f32 %v2823_v43, %v1378_v32 }
 0x1e9   : > { %1819 = vst.msk [vmem:[%s2849_s26 + $0xa8] sm:$0xff] %vm1797_vm8, %v1786_v31 }
 0x1ea   : > { %1818 = vst.msk [vmem:[%s2849_s26 + $0xa0] sm:$0xff] %vm1797_vm8, %v1785_v33  ;;  %v2355_v34 = vpop.f32.mrb[54].mxu0 }
 0x1eb   : > { %v1788_v35 = vmul.f32 %v2825_v44, %v2355_v34  ;;  %v1388_v36 = vpop.f32.mrb[55].mxu0 }
 0x1ec   : > { %v1787_v37 = vmul.f32 %v2827_v45, %v1388_v36 }
 0x1ed   : > { %1821 = vst.msk [vmem:[%s2849_s26 + $0xb8] sm:$0xff] %vm1797_vm8, %v1788_v35 }
 0x1ee   : > { %1820 = vst.msk [vmem:[%s2849_s26 + $0xb0] sm:$0xff] %vm1797_vm8, %v1787_v37  ;;  %v2358_v38 = vpop.f32.mrb[56].mxu0 }
 0x1ef   : > { %v1790_v39 = vmul.f32 %v2829_v46, %v2358_v38  ;;  %v1398_v40 = vpop.f32.mrb[57].mxu0 }
 0x1f0   : > { %v1789_v41 = vmul.f32 %v2831_v47, %v1398_v40 }
 0x1f1   : > { %1823 = vst.msk [vmem:[%s2849_s26 + $0xc8] sm:$0xff] %vm1797_vm8, %v1790_v39 }
 0x1f2   : > { %1822 = vst.msk [vmem:[%s2849_s26 + $0xc0] sm:$0xff] %vm1797_vm8, %v1789_v41  ;;  %v2361_v42 = vpop.f32.mrb[58].mxu0 }
 0x1f3   : > { %v1792_v43 = vmul.f32 %v2833_v48, %v2361_v42  ;;  %v1408_v44 = vpop.f32.mrb[59].mxu0 }
 0x1f4   : > { %v1791_v45 = vmul.f32 %v2835_v49, %v1408_v44 }
 0x1f5   : > { %1825 = vst.msk [vmem:[%s2849_s26 + $0xd8] sm:$0xff] %vm1797_vm8, %v1792_v43 }
 0x1f6   : > { %1824 = vst.msk [vmem:[%s2849_s26 + $0xd0] sm:$0xff] %vm1797_vm8, %v1791_v45  ;;  %v2364_v46 = vpop.f32.mrb[60].mxu0 }
 0x1f7   : > { %v1794_v54 = vmul.f32 %v2837_v50, %v2364_v46  ;;  %v1418_v47 = vpop.f32.mrb[61].mxu0 }
 0x1f8   : > { %v1793_v55 = vmul.f32 %v2839_v51, %v1418_v47 }
 0x1f9   : > { %1827 = vst.msk [vmem:[%s2849_s26 + $0xe8] sm:$0xff] %vm1797_vm8, %v1794_v54 }
 0x1fa   : > { %1826 = vst.msk [vmem:[%s2849_s26 + $0xe0] sm:$0xff] %vm1797_vm8, %v1793_v55  ;;  %v2367_v56 = vpop.f32.mrb[62].mxu0 }
 0x1fb   : > { %v1796_v48 = vmul.f32 %v2841_v52, %v2367_v56  ;;  %v1428_v57 = vpop.f32.mrb[63].mxu0 }
 0x1fc   : > { %v1795_v49 = vmul.f32 %v2843_v53, %v1428_v57 }
 0x1fd   : > { %1829 = vst.msk [vmem:[%s2849_s26 + $0xf8] sm:$0xff] %vm1797_vm8, %v1796_v48 }
 0x1fe   : > { %1828 = vst.msk [vmem:[%s2849_s26 + $0xf0] sm:$0xff] %vm1797_vm8, %v1795_v49 }
 0x1ff PF: > { %s17_s24 = sadd.s32 1, %s2461_s24  }
 0x200   : > { %p14_p4 = scmp.ge.s32.totalorder %s17_s24, 4  }
 0x202   :  { %16 = sbr.rel (!%p14_p4) target bundleno = 1 (0x1), region = 84 }

</bundles_post_ra>
